<compile_context>
chip_gen: v7x
topology: tpu7x:2x2x1
jax: 0.10.0
libtpu: 0.0.40
codegen_flags: <defaults>
</compile_context>

<pallas_src>
import math

import jax
import jax.numpy as jnp
from jax.experimental import pallas as pl
from jax.experimental.pallas import tpu as pltpu

EPS = 1e-5  # torch.nn.InstanceNorm2d default eps


# ----------------------------- fused kernel -----------------------------

def _make_kernel(H, W, C):
    """Fused GResidualBlock kernel for fixed spatial size and channel count."""
    Hp, Wp = H + 2, W + 2          # reflection-padded spatial size
    HWp = H * Wp                   # "band" length (H padded-width rows, lane dense)
    P2 = Hp * Wp + 2               # flat padded length (+2 tail lanes: every tap is a static slice)
    base = Wp + 1                  # flat offset of interior pixel (0, 0)
    O = 2                          # origin of the padded map in the ypad scratch (room for +/-2 lane reads)
    inv_hw = 1.0 / float(H * W)

    def kernel(xpad_ref,   # (1, C, P2)     bf16  reflection-padded input (flat)
               w1_ref,     # (C, 9*C)       bf16  conv1 fused weights, col = (dy*3+dx)*C + ci
               w2_ref,     # (C, 9*C)       bf16  conv2 fused weights
               vmask_ref,  # (1, HWp)       f32   1.0 where band lane is a real pixel
               dmask_ref,  # (1, C, HWp)    bf16  dropout mask {0., 2.} (0 at dead lanes)
               xres_ref,   # (1, C, HWp)    f32   residual input in band layout
               out_ref,    # (1, C, HWp)    f32   output in band layout
               ypad_ref,   # (C, P2+4)      bf16  scratch: padded stage-1 activation
               stk_ref):   # (9*C, HWp)     bf16  scratch: stacked conv taps (im2col in VMEM)
        vm = vmask_ref[...]                                   # (1, HWp), loaded once

        def conv3x3(read_tap, w_ref):
            # Stack the 9 shifted lane slices along sublanes, then ONE
            # (C, 9C) @ (9C, HWp) MXU matmul with f32 accumulation.
            for dy in range(3):
                for dx in range(3):
                    k = dy * 3 + dx
                    stk_ref[k * C:(k + 1) * C, :] = read_tap(dy * Wp + dx)
            return jnp.dot(w_ref[...], stk_ref[...],
                           preferred_element_type=jnp.float32)

        def instance_norm(acc):
            # Single-pass masked stats over the H*W real pixels (matches reference).
            avm = acc * vm
            s = jnp.sum(avm, axis=-1, keepdims=True)
            s2 = jnp.sum(avm * acc, axis=-1, keepdims=True)
            mean = s * inv_hw
            var = s2 * inv_hw - mean * mean
            return (acc - mean) * jax.lax.rsqrt(var + EPS)

        # ---- stage 1: conv -> InstanceNorm -> ReLU -> Dropout (stays in VMEM) ----
        acc1 = conv3x3(lambda s0: xpad_ref[0, :, s0:s0 + HWp], w1_ref)
        h1 = jnp.maximum(instance_norm(acc1), 0.0) * dmask_ref[0].astype(jnp.float32)

        # ---- reflection-pad h1 into the bf16 VMEM scratch (vectorized) ----
        # Single f32 -> bf16 cast; band dead lanes land on pad columns (overwritten below).
        ypad_ref[:, O + base:O + base + HWp] = h1.astype(jnp.bfloat16)
        # Top / bottom reflected rows first; their corners are fixed by the column
        # pass below, which must run after these copies.
        ypad_ref[:, O:O + Wp] = ypad_ref[:, O + 2 * Wp:O + 3 * Wp]
        ypad_ref[:, O + (Hp - 1) * Wp:O + Hp * Wp] = ypad_ref[:, O + (H - 1) * Wp:O + H * Wp]
        # Left / right reflected columns of EVERY row in one vectorized pass:
        # +/-2-lane shifted ref loads (the scratch has 2 spare lanes on each side)
        # selected by an iota column mask -> one lane-dense store.
        cur = ypad_ref[:, O:O + P2]
        sl = ypad_ref[:, O + 2:O + 2 + P2]      # value 2 lanes to the right
        sr = ypad_ref[:, O - 2:O - 2 + P2]      # value 2 lanes to the left
        lane = jax.lax.broadcasted_iota(jnp.int32, (1, P2), 1)
        col = lane % Wp
        fixed = jnp.where(col == 0, sl, cur)
        fixed = jnp.where(col == Wp - 1, sr, fixed)
        fixed = jnp.where(lane >= Hp * Wp, 0.0, fixed)   # keep the 2 tail lanes finite
        ypad_ref[:, O:O + P2] = fixed

        # ---- stage 2: conv -> InstanceNorm -> residual add ----
        acc2 = conv3x3(lambda s0: ypad_ref[:, O + s0:O + s0 + HWp], w2_ref)
        out_ref[0] = xres_ref[0] + instance_norm(acc2)

    return kernel


# ----------------------------- wrapper -----------------------------

def g_residual_block(x, w1, b1, w2, b2, dropout_mask):
    """x: (N, C, H, W) f32;  w*: (C, C, 3, 3);  b*: (C,) (cancelled by InstanceNorm);
    dropout_mask: (N, C, H, W) f32 with values in {0., 2.} (nn.Dropout(0.5), training).
    Returns x + conv_path(x), shape (N, C, H, W)."""
    del b1, b2  # InstanceNorm2d(affine=False) subtracts the per-channel mean -> biases cancel.

    N, C, H, W = x.shape
    Co = w1.shape[0]
    assert Co == C, "GResidualBlock requires in_channels == out_channels"
    Hp, Wp = H + 2, W + 2
    HWp = H * Wp
    P2 = Hp * Wp + 2

    # fused conv weights (Co, 9*Ci): column index = (dy*3 + dx)*Ci + ci   (bf16 for the MXU)
    w1f = jnp.transpose(w1, (0, 2, 3, 1)).reshape(Co, 9 * C).astype(jnp.bfloat16)
    w2f = jnp.transpose(w2, (0, 2, 3, 1)).reshape(Co, 9 * C).astype(jnp.bfloat16)

    # reflection-padded input, flattened row-major, +2 tail lanes so every 3x3 tap
    # is a static length-HWp lane slice (no host-side im2col).
    xpad = jnp.pad(x, ((0, 0), (0, 0), (1, 1), (1, 1)), mode="reflect")
    xpad_flat = jnp.pad(xpad.reshape(N, C, Hp * Wp),
                        ((0, 0), (0, 0), (0, 2))).astype(jnp.bfloat16)

    # residual input and dropout mask re-laid out on the (H, Wp) "band"
    xres = jnp.pad(x, ((0, 0), (0, 0), (0, 0), (0, 2))).reshape(N, C, HWp).astype(jnp.float32)
    dmask_band = jnp.pad(dropout_mask, ((0, 0), (0, 0), (0, 0), (0, 2))
                         ).reshape(N, C, HWp).astype(jnp.bfloat16)   # {0., 2.} exact in bf16
    vmask = ((jnp.arange(HWp) % Wp) < W).astype(jnp.float32)[None, :]

    # explicit VMEM budget: BlockSpec inputs/outputs are double-buffered
    blk_bytes = (C * P2 * 2 + 2 * (Co * 9 * C * 2) + HWp * 4
                 + C * HWp * 2 + 2 * (C * HWp * 4))
    scratch_bytes = Co * (P2 + 4) * 2 + 9 * C * HWp * 2
    vmem_limit = int(min(max(4 * (2 * blk_bytes + scratch_bytes), 8 * 1024 * 1024),
                         100 * 1024 * 1024))

    out_band = pl.pallas_call(
        _make_kernel(H, W, C),
        out_shape=jax.ShapeDtypeStruct((N, Co, HWp), jnp.float32),
        grid_spec=pltpu.PrefetchScalarGridSpec(
            num_scalar_prefetch=0,
            grid=(N,),
            in_specs=[
                pl.BlockSpec((1, C, P2), lambda n: (n, 0, 0)),     # xpad_flat
                pl.BlockSpec((Co, 9 * C), lambda n: (0, 0)),       # fused w1
                pl.BlockSpec((Co, 9 * C), lambda n: (0, 0)),       # fused w2
                pl.BlockSpec((1, HWp), lambda n: (0, 0)),          # valid mask
                pl.BlockSpec((1, Co, HWp), lambda n: (n, 0, 0)),   # dropout mask (bf16)
                pl.BlockSpec((1, C, HWp), lambda n: (n, 0, 0)),    # residual x
            ],
            out_specs=pl.BlockSpec((1, Co, HWp), lambda n: (n, 0, 0)),
            scratch_shapes=[
                pltpu.VMEM((Co, P2 + 4), jnp.bfloat16),            # padded stage-1 act.
                pltpu.VMEM((9 * C, HWp), jnp.bfloat16),            # stacked conv taps
            ],
        ),
        input_output_aliases={5: 0},   # output reuses the residual-input HBM buffer
        compiler_params=pltpu.CompilerParams(
            dimension_semantics=("parallel",),     # batch grid -> both v7x cores
            vmem_limit_bytes=vmem_limit),
    )(xpad_flat, w1f, w2f, vmask, dmask_band, xres)

    # band (H, Wp) -> (H, W): drop the two dead lanes per row
    return out_band.reshape(N, Co, H, Wp)[..., :W]


# ----------------------------- pure-JAX reference -----------------------------

def _reference(x, w1, w2, dropout_mask):
    """Reference with the same bf16 rounding of the matmul operands."""
    N, C, H, W = x.shape
    xb = x.astype(jnp.bfloat16).astype(jnp.float32)
    w1b = w1.astype(jnp.bfloat16).astype(jnp.float32)
    w2b = w2.astype(jnp.bfloat16).astype(jnp.float32)

    def conv3x3_reflect(inp, w):
        p = jnp.pad(inp, ((0, 0), (0, 0), (1, 1), (1, 1)), mode="reflect")
        pat = jnp.stack([p[:, :, dy:dy + H, dx:dx + W]
                         for dy in range(3) for dx in range(3)], axis=2)
        wk = w.reshape(w.shape[0], w.shape[1], 9)
        return jnp.einsum("ock,nckyx->noyx", wk, pat,
                          precision=jax.lax.Precision.HIGHEST)

    def inorm(a):
        m = jnp.mean(a, axis=(2, 3), keepdims=True)
        m2 = jnp.mean(a * a, axis=(2, 3), keepdims=True)
        return (a - m) * jax.lax.rsqrt(m2 - m * m + EPS)

    h = jnp.maximum(inorm(conv3x3_reflect(xb, w1b)), 0.0) * dropout_mask
    h = h.astype(jnp.bfloat16).astype(jnp.float32)
    h = inorm(conv3x3_reflect(h, w2b))
    return x + h


# ----------------------------- demo -----------------------------

if __name__ == "__main__":
    # GResidualBlock needs in_channels == out_channels (residual + 2nd conv).
    N, C, H, W = 2, 8, 16, 16

    key = jax.random.PRNGKey(0)
    kx, kw1, kb1, kw2, kb2, kd = jax.random.split(key, 6)

    x = jax.random.normal(kx, (N, C, H, W), dtype=jnp.float32)

    # PyTorch Conv2d-style uniform init bounds
    fan_in = C * 3 * 3
    bound = 1.0 / math.sqrt(fan_in)
    w1 = jax.random.uniform(kw1, (C, C, 3, 3), minval=-bound, maxval=bound, dtype=jnp.float32)
    b1 = jax.random.uniform(kb1, (C,), minval=-bound, maxval=bound, dtype=jnp.float32)
    w2 = jax.random.uniform(kw2, (C, C, 3, 3), minval=-bound, maxval=bound, dtype=jnp.float32)
    b2 = jax.random.uniform(kb2, (C,), minval=-bound, maxval=bound, dtype=jnp.float32)

    # nn.Dropout(0.5), training mode: keep w.p. 0.5, scale kept values by 2.
    keep = jax.random.bernoulli(kd, 0.5, (N, C, H, W))
    drop_mask = keep.astype(jnp.float32) * 2.0

    fwd = jax.jit(g_residual_block)
    out = jax.block_until_ready(fwd(x, w1, b1, w2, b2, drop_mask))
    ref = jax.block_until_ready(_reference(x, w1, w2, drop_mask))

    assert out.shape == (N, C, H, W)
    assert bool(jnp.all(jnp.isfinite(out)))
    err = float(jnp.max(jnp.abs(out - ref)))
    assert err < 5e-2, f"max |kernel - reference| = {err}"
    print("KERNEL_OK")
</pallas_src>

<mosaic_0001>
module attributes {stable_mosaic.version = 11 : i64} {
  func.func @kernel(%arg0: i32, %arg1: memref<1x8x326xbf16, #tpu.memory_space<vmem>>, %arg2: memref<8x72xbf16, #tpu.memory_space<vmem>>, %arg3: memref<8x72xbf16, #tpu.memory_space<vmem>>, %arg4: memref<1x288xf32, #tpu.memory_space<vmem>>, %arg5: memref<1x8x288xbf16, #tpu.memory_space<vmem>>, %arg6: memref<1x8x288xf32, #tpu.memory_space<vmem>>, %arg7: memref<1x8x288xf32, #tpu.memory_space<vmem>>, %arg8: memref<8x330xbf16, #tpu.memory_space<vmem>>, %arg9: memref<72x288xbf16, #tpu.memory_space<vmem>>) attributes {dimension_semantics = [#tpu.dimension_semantics<parallel>], iteration_bounds = array<i64: 2>, scalar_prefetch = 0 : i64, scratch_operands = 2 : i64, tpu.core_type = #tpu.core_type<tc>, window_params = [{transform_indices = @transform_0, window_bounds = array<i64: 1, 8, 326>}, {pipeline_mode = #tpu.pipeline_mode<synchronous>, transform_indices = @transform_1, window_bounds = array<i64: 8, 72>}, {pipeline_mode = #tpu.pipeline_mode<synchronous>, transform_indices = @transform_2, window_bounds = array<i64: 8, 72>}, {pipeline_mode = #tpu.pipeline_mode<synchronous>, transform_indices = @transform_3, window_bounds = array<i64: 1, 288>}, {transform_indices = @transform_4, window_bounds = array<i64: 1, 8, 288>}, {transform_indices = @transform_5, window_bounds = array<i64: 1, 8, 288>}, {transform_indices = @transform_6, window_bounds = array<i64: 1, 8, 288>}]} {
    %c0 = arith.constant 0 : index
    %c0_0 = arith.constant 0 : index
    %0 = vector.load %arg4[%c0, %c0_0] : memref<1x288xf32, #tpu.memory_space<vmem>>, vector<1x288xf32>
    %c0_1 = arith.constant 0 : index
    %c0_2 = arith.constant 0 : index
    %c0_3 = arith.constant 0 : index
    %1 = vector.load %arg1[%c0_1, %c0_2, %c0_3] : memref<1x8x326xbf16, #tpu.memory_space<vmem>>, vector<1x8x288xbf16>
    %2 = vector.shape_cast %1 : vector<1x8x288xbf16> to vector<8x288xbf16>
    %c0_4 = arith.constant 0 : index
    %c0_5 = arith.constant 0 : index
    %3 = vector.load %arg9[%c0_4, %c0_5] : memref<72x288xbf16, #tpu.memory_space<vmem>>, vector<8x288xbf16>
    tpu.vector_store %arg9[%c0_4, %c0_5], %2 {strides = array<i32>} : memref<72x288xbf16, #tpu.memory_space<vmem>>, vector<8x288xbf16>,
    %c0_6 = arith.constant 0 : index
    %c0_7 = arith.constant 0 : index
    %c1 = arith.constant 1 : index
    %4 = vector.load %arg1[%c0_6, %c0_7, %c1] : memref<1x8x326xbf16, #tpu.memory_space<vmem>>, vector<1x8x288xbf16>
    %5 = vector.shape_cast %4 : vector<1x8x288xbf16> to vector<8x288xbf16>
    %c8 = arith.constant 8 : index
    %c0_8 = arith.constant 0 : index
    %6 = vector.load %arg9[%c8, %c0_8] : memref<72x288xbf16, #tpu.memory_space<vmem>>, vector<8x288xbf16>
    tpu.vector_store %arg9[%c8, %c0_8], %5 {strides = array<i32>} : memref<72x288xbf16, #tpu.memory_space<vmem>>, vector<8x288xbf16>,
    %c0_9 = arith.constant 0 : index
    %c0_10 = arith.constant 0 : index
    %c2 = arith.constant 2 : index
    %7 = vector.load %arg1[%c0_9, %c0_10, %c2] : memref<1x8x326xbf16, #tpu.memory_space<vmem>>, vector<1x8x288xbf16>
    %8 = vector.shape_cast %7 : vector<1x8x288xbf16> to vector<8x288xbf16>
    %c16 = arith.constant 16 : index
    %c0_11 = arith.constant 0 : index
    %9 = vector.load %arg9[%c16, %c0_11] : memref<72x288xbf16, #tpu.memory_space<vmem>>, vector<8x288xbf16>
    tpu.vector_store %arg9[%c16, %c0_11], %8 {strides = array<i32>} : memref<72x288xbf16, #tpu.memory_space<vmem>>, vector<8x288xbf16>,
    %c0_12 = arith.constant 0 : index
    %c0_13 = arith.constant 0 : index
    %c18 = arith.constant 18 : index
    %10 = vector.load %arg1[%c0_12, %c0_13, %c18] : memref<1x8x326xbf16, #tpu.memory_space<vmem>>, vector<1x8x288xbf16>
    %11 = vector.shape_cast %10 : vector<1x8x288xbf16> to vector<8x288xbf16>
    %c24 = arith.constant 24 : index
    %c0_14 = arith.constant 0 : index
    %12 = vector.load %arg9[%c24, %c0_14] : memref<72x288xbf16, #tpu.memory_space<vmem>>, vector<8x288xbf16>
    tpu.vector_store %arg9[%c24, %c0_14], %11 {strides = array<i32>} : memref<72x288xbf16, #tpu.memory_space<vmem>>, vector<8x288xbf16>,
    %c0_15 = arith.constant 0 : index
    %c0_16 = arith.constant 0 : index
    %c19 = arith.constant 19 : index
    %13 = vector.load %arg1[%c0_15, %c0_16, %c19] : memref<1x8x326xbf16, #tpu.memory_space<vmem>>, vector<1x8x288xbf16>
    %14 = vector.shape_cast %13 : vector<1x8x288xbf16> to vector<8x288xbf16>
    %c32 = arith.constant 32 : index
    %c0_17 = arith.constant 0 : index
    %15 = vector.load %arg9[%c32, %c0_17] : memref<72x288xbf16, #tpu.memory_space<vmem>>, vector<8x288xbf16>
    tpu.vector_store %arg9[%c32, %c0_17], %14 {strides = array<i32>} : memref<72x288xbf16, #tpu.memory_space<vmem>>, vector<8x288xbf16>,
    %c0_18 = arith.constant 0 : index
    %c0_19 = arith.constant 0 : index
    %c20 = arith.constant 20 : index
    %16 = vector.load %arg1[%c0_18, %c0_19, %c20] : memref<1x8x326xbf16, #tpu.memory_space<vmem>>, vector<1x8x288xbf16>
    %17 = vector.shape_cast %16 : vector<1x8x288xbf16> to vector<8x288xbf16>
    %c40 = arith.constant 40 : index
    %c0_20 = arith.constant 0 : index
    %18 = vector.load %arg9[%c40, %c0_20] : memref<72x288xbf16, #tpu.memory_space<vmem>>, vector<8x288xbf16>
    tpu.vector_store %arg9[%c40, %c0_20], %17 {strides = array<i32>} : memref<72x288xbf16, #tpu.memory_space<vmem>>, vector<8x288xbf16>,
    %c0_21 = arith.constant 0 : index
    %c0_22 = arith.constant 0 : index
    %c36 = arith.constant 36 : index
    %19 = vector.load %arg1[%c0_21, %c0_22, %c36] : memref<1x8x326xbf16, #tpu.memory_space<vmem>>, vector<1x8x288xbf16>
    %20 = vector.shape_cast %19 : vector<1x8x288xbf16> to vector<8x288xbf16>
    %c48 = arith.constant 48 : index
    %c0_23 = arith.constant 0 : index
    %21 = vector.load %arg9[%c48, %c0_23] : memref<72x288xbf16, #tpu.memory_space<vmem>>, vector<8x288xbf16>
    tpu.vector_store %arg9[%c48, %c0_23], %20 {strides = array<i32>} : memref<72x288xbf16, #tpu.memory_space<vmem>>, vector<8x288xbf16>,
    %c0_24 = arith.constant 0 : index
    %c0_25 = arith.constant 0 : index
    %c37 = arith.constant 37 : index
    %22 = vector.load %arg1[%c0_24, %c0_25, %c37] : memref<1x8x326xbf16, #tpu.memory_space<vmem>>, vector<1x8x288xbf16>
    %23 = vector.shape_cast %22 : vector<1x8x288xbf16> to vector<8x288xbf16>
    %c56 = arith.constant 56 : index
    %c0_26 = arith.constant 0 : index
    %24 = vector.load %arg9[%c56, %c0_26] : memref<72x288xbf16, #tpu.memory_space<vmem>>, vector<8x288xbf16>
    tpu.vector_store %arg9[%c56, %c0_26], %23 {strides = array<i32>} : memref<72x288xbf16, #tpu.memory_space<vmem>>, vector<8x288xbf16>,
    %c0_27 = arith.constant 0 : index
    %c0_28 = arith.constant 0 : index
    %c38 = arith.constant 38 : index
    %25 = vector.load %arg1[%c0_27, %c0_28, %c38] : memref<1x8x326xbf16, #tpu.memory_space<vmem>>, vector<1x8x288xbf16>
    %26 = vector.shape_cast %25 : vector<1x8x288xbf16> to vector<8x288xbf16>
    %c64 = arith.constant 64 : index
    %c0_29 = arith.constant 0 : index
    %27 = vector.load %arg9[%c64, %c0_29] : memref<72x288xbf16, #tpu.memory_space<vmem>>, vector<8x288xbf16>
    tpu.vector_store %arg9[%c64, %c0_29], %26 {strides = array<i32>} : memref<72x288xbf16, #tpu.memory_space<vmem>>, vector<8x288xbf16>,
    %c0_30 = arith.constant 0 : index
    %c0_31 = arith.constant 0 : index
    %28 = vector.load %arg2[%c0_30, %c0_31] : memref<8x72xbf16, #tpu.memory_space<vmem>>, vector<8x72xbf16>
    %c0_32 = arith.constant 0 : index
    %c0_33 = arith.constant 0 : index
    %29 = vector.load %arg9[%c0_32, %c0_33] : memref<72x288xbf16, #tpu.memory_space<vmem>>, vector<72x288xbf16>
    %cst = arith.constant dense<0.000000e+00> : vector<8x288xf32>
    %30 = tpu.matmul %28, %29, %cst {dimension_numbers = #tpu.dot_dimension_numbers<[1], [0], [0], [1], [0, 0, 1, 1], [], []>} : vector<8x72xbf16>, vector<72x288xbf16>, vector<8x288xf32> -> vector<8x288xf32>
    %31 = vector.broadcast %0 : vector<1x288xf32> to vector<8x288xf32>
    %32 = arith.mulf %30, %31 : vector<8x288xf32>
    %cst_34 = arith.constant dense<0.000000e+00> : vector<8xf32>
    %33 = vector.multi_reduction <add>, %32, %cst_34 [1] : vector<8x288xf32> to vector<8xf32>
    %34 = vector.shape_cast %33 : vector<8xf32> to vector<8x1xf32>
    %35 = arith.mulf %32, %30 : vector<8x288xf32>
    %cst_35 = arith.constant dense<0.000000e+00> : vector<8xf32>
    %36 = vector.multi_reduction <add>, %35, %cst_35 [1] : vector<8x288xf32> to vector<8xf32>
    %37 = vector.shape_cast %36 : vector<8xf32> to vector<8x1xf32>
    %cst_36 = arith.constant 3.906250e-03 : f32
    %38 = vector.broadcast %cst_36 : f32 to vector<8x1xf32>
    %39 = arith.mulf %34, %38 : vector<8x1xf32>
    %cst_37 = arith.constant 3.906250e-03 : f32
    %40 = vector.broadcast %cst_37 : f32 to vector<8x1xf32>
    %41 = arith.mulf %37, %40 : vector<8x1xf32>
    %42 = arith.mulf %39, %39 : vector<8x1xf32>
    %43 = arith.subf %41, %42 : vector<8x1xf32>
    %44 = vector.broadcast %39 : vector<8x1xf32> to vector<8x288xf32>
    %45 = arith.subf %30, %44 : vector<8x288xf32>
    %cst_38 = arith.constant 9.99999974E-6 : f32
    %46 = vector.broadcast %cst_38 : f32 to vector<8x1xf32>
    %47 = arith.addf %43, %46 : vector<8x1xf32>
    %48 = math.rsqrt %47 : vector<8x1xf32>
    %49 = vector.broadcast %48 : vector<8x1xf32> to vector<8x288xf32>
    %50 = arith.mulf %45, %49 : vector<8x288xf32>
    %cst_39 = arith.constant 0.000000e+00 : f32
    %51 = vector.broadcast %cst_39 : f32 to vector<8x288xf32>
    %52 = arith.maximumf %50, %51 : vector<8x288xf32>
    %c0_40 = arith.constant 0 : index
    %c0_41 = arith.constant 0 : index
    %c0_42 = arith.constant 0 : index
    %53 = vector.load %arg5[%c0_40, %c0_41, %c0_42] : memref<1x8x288xbf16, #tpu.memory_space<vmem>>, vector<1x8x288xbf16>
    %54 = vector.shape_cast %53 : vector<1x8x288xbf16> to vector<8x288xbf16>
    %55 = arith.extf %54 : vector<8x288xbf16> to vector<8x288xf32>
    %56 = arith.mulf %52, %55 : vector<8x288xf32>
    %57 = arith.truncf %56 : vector<8x288xf32> to vector<8x288xbf16>
    %c0_43 = arith.constant 0 : index
    %c21 = arith.constant 21 : index
    %58 = vector.load %arg8[%c0_43, %c21] : memref<8x330xbf16, #tpu.memory_space<vmem>>, vector<8x288xbf16>
    tpu.vector_store %arg8[%c0_43, %c21], %57 {strides = array<i32>} : memref<8x330xbf16, #tpu.memory_space<vmem>>, vector<8x288xbf16>,
    %c0_44 = arith.constant 0 : index
    %c38_45 = arith.constant 38 : index
    %59 = vector.load %arg8[%c0_44, %c38_45] : memref<8x330xbf16, #tpu.memory_space<vmem>>, vector<8x18xbf16>
    %c0_46 = arith.constant 0 : index
    %c2_47 = arith.constant 2 : index
    %60 = vector.load %arg8[%c0_46, %c2_47] : memref<8x330xbf16, #tpu.memory_space<vmem>>, vector<8x18xbf16>
    tpu.vector_store %arg8[%c0_46, %c2_47], %59 {strides = array<i32>} : memref<8x330xbf16, #tpu.memory_space<vmem>>, vector<8x18xbf16>,
    %c0_48 = arith.constant 0 : index
    %c272 = arith.constant 272 : index
    %61 = vector.load %arg8[%c0_48, %c272] : memref<8x330xbf16, #tpu.memory_space<vmem>>, vector<8x18xbf16>
    %c0_49 = arith.constant 0 : index
    %c308 = arith.constant 308 : index
    %62 = vector.load %arg8[%c0_49, %c308] : memref<8x330xbf16, #tpu.memory_space<vmem>>, vector<8x18xbf16>
    tpu.vector_store %arg8[%c0_49, %c308], %61 {strides = array<i32>} : memref<8x330xbf16, #tpu.memory_space<vmem>>, vector<8x18xbf16>,
    %c0_50 = arith.constant 0 : index
    %c2_51 = arith.constant 2 : index
    %63 = vector.load %arg8[%c0_50, %c2_51] : memref<8x330xbf16, #tpu.memory_space<vmem>>, vector<8x326xbf16>
    %c0_52 = arith.constant 0 : index
    %c4 = arith.constant 4 : index
    %64 = vector.load %arg8[%c0_52, %c4] : memref<8x330xbf16, #tpu.memory_space<vmem>>, vector<8x326xbf16>
    %c0_53 = arith.constant 0 : index
    %c0_54 = arith.constant 0 : index
    %65 = vector.load %arg8[%c0_53, %c0_54] : memref<8x330xbf16, #tpu.memory_space<vmem>>, vector<8x326xbf16>
    %66 = tpu.iota {dimensions = array<i32: 1>} : vector<1x326xi32>
    %c18_i32 = arith.constant 18 : i32
    %c0_i32 = arith.constant 0 : i32
    %67 = arith.cmpi eq, %c18_i32, %c0_i32 : i32
    %c1_i32 = arith.constant 1 : i32
    %68 = arith.select %67, %c1_i32, %c18_i32 : i32
    %69 = vector.broadcast %68 : i32 to vector<1x326xi32>
    %70 = arith.remsi %66, %69 : vector<1x326xi32>
    %c0_i32_55 = arith.constant 0 : i32
    %71 = vector.broadcast %c0_i32_55 : i32 to vector<1x326xi32>
    %72 = arith.cmpi ne, %70, %71 : vector<1x326xi32>
    %c0_i32_56 = arith.constant 0 : i32
    %73 = vector.broadcast %c0_i32_56 : i32 to vector<1x326xi32>
    %74 = arith.cmpi slt, %70, %73 : vector<1x326xi32>
    %c0_i32_57 = arith.constant 0 : i32
    %75 = arith.cmpi slt, %68, %c0_i32_57 : i32
    %76 = vector.broadcast %75 : i1 to vector<1x326xi1>
    %77 = vector.broadcast %76 : vector<1x326xi1> to vector<1x326xi1>
    %78 = arith.xori %74, %77 : vector<1x326xi1>
    %79 = arith.andi %78, %72 : vector<1x326xi1>
    %80 = vector.broadcast %68 : i32 to vector<1x326xi32>
    %81 = arith.addi %70, %80 : vector<1x326xi32>
    %82 = arith.select %79, %81, %70 : vector<1x326xi1>, vector<1x326xi32>
    %c0_i32_58 = arith.constant 0 : i32
    %83 = vector.broadcast %c0_i32_58 : i32 to vector<1x326xi32>
    %84 = arith.cmpi eq, %82, %83 : vector<1x326xi32>
    %85 = vector.shape_cast %84 : vector<1x326xi1> to vector<1x326xi1>
    %86 = vector.broadcast %85 : vector<1x326xi1> to vector<8x326xi1>
    %87 = arith.select %86, %64, %63 : vector<8x326xi1>, vector<8x326xbf16>
    %c17_i32 = arith.constant 17 : i32
    %88 = vector.broadcast %c17_i32 : i32 to vector<1x326xi32>
    %89 = arith.cmpi eq, %82, %88 : vector<1x326xi32>
    %90 = vector.shape_cast %89 : vector<1x326xi1> to vector<1x326xi1>
    %91 = vector.broadcast %90 : vector<1x326xi1> to vector<8x326xi1>
    %92 = arith.select %91, %65, %87 : vector<8x326xi1>, vector<8x326xbf16>
    %c324_i32 = arith.constant 324 : i32
    %93 = vector.broadcast %c324_i32 : i32 to vector<1x326xi32>
    %94 = arith.cmpi sge, %66, %93 : vector<1x326xi32>
    %cst_59 = arith.constant 0.000000e+00 : f32
    %95 = arith.truncf %cst_59 : f32 to bf16
    %96 = vector.shape_cast %94 : vector<1x326xi1> to vector<1x326xi1>
    %97 = vector.broadcast %96 : vector<1x326xi1> to vector<8x326xi1>
    %98 = vector.broadcast %95 : bf16 to vector<8x326xbf16>
    %99 = arith.select %97, %98, %92 : vector<8x326xi1>, vector<8x326xbf16>
    %c0_60 = arith.constant 0 : index
    %c2_61 = arith.constant 2 : index
    %100 = vector.load %arg8[%c0_60, %c2_61] : memref<8x330xbf16, #tpu.memory_space<vmem>>, vector<8x326xbf16>
    tpu.vector_store %arg8[%c0_60, %c2_61], %99 {strides = array<i32>} : memref<8x330xbf16, #tpu.memory_space<vmem>>, vector<8x326xbf16>,
    %c0_62 = arith.constant 0 : index
    %c2_63 = arith.constant 2 : index
    %101 = vector.load %arg8[%c0_62, %c2_63] : memref<8x330xbf16, #tpu.memory_space<vmem>>, vector<8x288xbf16>
    %c0_64 = arith.constant 0 : index
    %c0_65 = arith.constant 0 : index
    %102 = vector.load %arg9[%c0_64, %c0_65] : memref<72x288xbf16, #tpu.memory_space<vmem>>, vector<8x288xbf16>
    tpu.vector_store %arg9[%c0_64, %c0_65], %101 {strides = array<i32>} : memref<72x288xbf16, #tpu.memory_space<vmem>>, vector<8x288xbf16>,
    %c0_66 = arith.constant 0 : index
    %c3 = arith.constant 3 : index
    %103 = vector.load %arg8[%c0_66, %c3] : memref<8x330xbf16, #tpu.memory_space<vmem>>, vector<8x288xbf16>
    %c8_67 = arith.constant 8 : index
    %c0_68 = arith.constant 0 : index
    %104 = vector.load %arg9[%c8_67, %c0_68] : memref<72x288xbf16, #tpu.memory_space<vmem>>, vector<8x288xbf16>
    tpu.vector_store %arg9[%c8_67, %c0_68], %103 {strides = array<i32>} : memref<72x288xbf16, #tpu.memory_space<vmem>>, vector<8x288xbf16>,
    %c0_69 = arith.constant 0 : index
    %c4_70 = arith.constant 4 : index
    %105 = vector.load %arg8[%c0_69, %c4_70] : memref<8x330xbf16, #tpu.memory_space<vmem>>, vector<8x288xbf16>
    %c16_71 = arith.constant 16 : index
    %c0_72 = arith.constant 0 : index
    %106 = vector.load %arg9[%c16_71, %c0_72] : memref<72x288xbf16, #tpu.memory_space<vmem>>, vector<8x288xbf16>
    tpu.vector_store %arg9[%c16_71, %c0_72], %105 {strides = array<i32>} : memref<72x288xbf16, #tpu.memory_space<vmem>>, vector<8x288xbf16>,
    %c0_73 = arith.constant 0 : index
    %c20_74 = arith.constant 20 : index
    %107 = vector.load %arg8[%c0_73, %c20_74] : memref<8x330xbf16, #tpu.memory_space<vmem>>, vector<8x288xbf16>
    %c24_75 = arith.constant 24 : index
    %c0_76 = arith.constant 0 : index
    %108 = vector.load %arg9[%c24_75, %c0_76] : memref<72x288xbf16, #tpu.memory_space<vmem>>, vector<8x288xbf16>
    tpu.vector_store %arg9[%c24_75, %c0_76], %107 {strides = array<i32>} : memref<72x288xbf16, #tpu.memory_space<vmem>>, vector<8x288xbf16>,
    %c0_77 = arith.constant 0 : index
    %c21_78 = arith.constant 21 : index
    %109 = vector.load %arg8[%c0_77, %c21_78] : memref<8x330xbf16, #tpu.memory_space<vmem>>, vector<8x288xbf16>
    %c32_79 = arith.constant 32 : index
    %c0_80 = arith.constant 0 : index
    %110 = vector.load %arg9[%c32_79, %c0_80] : memref<72x288xbf16, #tpu.memory_space<vmem>>, vector<8x288xbf16>
    tpu.vector_store %arg9[%c32_79, %c0_80], %109 {strides = array<i32>} : memref<72x288xbf16, #tpu.memory_space<vmem>>, vector<8x288xbf16>,
    %c0_81 = arith.constant 0 : index
    %c22 = arith.constant 22 : index
    %111 = vector.load %arg8[%c0_81, %c22] : memref<8x330xbf16, #tpu.memory_space<vmem>>, vector<8x288xbf16>
    %c40_82 = arith.constant 40 : index
    %c0_83 = arith.constant 0 : index
    %112 = vector.load %arg9[%c40_82, %c0_83] : memref<72x288xbf16, #tpu.memory_space<vmem>>, vector<8x288xbf16>
    tpu.vector_store %arg9[%c40_82, %c0_83], %111 {strides = array<i32>} : memref<72x288xbf16, #tpu.memory_space<vmem>>, vector<8x288xbf16>,
    %c0_84 = arith.constant 0 : index
    %c38_85 = arith.constant 38 : index
    %113 = vector.load %arg8[%c0_84, %c38_85] : memref<8x330xbf16, #tpu.memory_space<vmem>>, vector<8x288xbf16>
    %c48_86 = arith.constant 48 : index
    %c0_87 = arith.constant 0 : index
    %114 = vector.load %arg9[%c48_86, %c0_87] : memref<72x288xbf16, #tpu.memory_space<vmem>>, vector<8x288xbf16>
    tpu.vector_store %arg9[%c48_86, %c0_87], %113 {strides = array<i32>} : memref<72x288xbf16, #tpu.memory_space<vmem>>, vector<8x288xbf16>,
    %c0_88 = arith.constant 0 : index
    %c39 = arith.constant 39 : index
    %115 = vector.load %arg8[%c0_88, %c39] : memref<8x330xbf16, #tpu.memory_space<vmem>>, vector<8x288xbf16>
    %c56_89 = arith.constant 56 : index
    %c0_90 = arith.constant 0 : index
    %116 = vector.load %arg9[%c56_89, %c0_90] : memref<72x288xbf16, #tpu.memory_space<vmem>>, vector<8x288xbf16>
    tpu.vector_store %arg9[%c56_89, %c0_90], %115 {strides = array<i32>} : memref<72x288xbf16, #tpu.memory_space<vmem>>, vector<8x288xbf16>,
    %c0_91 = arith.constant 0 : index
    %c40_92 = arith.constant 40 : index
    %117 = vector.load %arg8[%c0_91, %c40_92] : memref<8x330xbf16, #tpu.memory_space<vmem>>, vector<8x288xbf16>
    %c64_93 = arith.constant 64 : index
    %c0_94 = arith.constant 0 : index
    %118 = vector.load %arg9[%c64_93, %c0_94] : memref<72x288xbf16, #tpu.memory_space<vmem>>, vector<8x288xbf16>
    tpu.vector_store %arg9[%c64_93, %c0_94], %117 {strides = array<i32>} : memref<72x288xbf16, #tpu.memory_space<vmem>>, vector<8x288xbf16>,
    %c0_95 = arith.constant 0 : index
    %c0_96 = arith.constant 0 : index
    %119 = vector.load %arg3[%c0_95, %c0_96] : memref<8x72xbf16, #tpu.memory_space<vmem>>, vector<8x72xbf16>
    %c0_97 = arith.constant 0 : index
    %c0_98 = arith.constant 0 : index
    %120 = vector.load %arg9[%c0_97, %c0_98] : memref<72x288xbf16, #tpu.memory_space<vmem>>, vector<72x288xbf16>
    %cst_99 = arith.constant dense<0.000000e+00> : vector<8x288xf32>
    %121 = tpu.matmul %119, %120, %cst_99 {dimension_numbers = #tpu.dot_dimension_numbers<[1], [0], [0], [1], [0, 0, 1, 1], [], []>} : vector<8x72xbf16>, vector<72x288xbf16>, vector<8x288xf32> -> vector<8x288xf32>
    %c0_100 = arith.constant 0 : index
    %c0_101 = arith.constant 0 : index
    %c0_102 = arith.constant 0 : index
    %122 = vector.load %arg6[%c0_100, %c0_101, %c0_102] : memref<1x8x288xf32, #tpu.memory_space<vmem>>, vector<1x8x288xf32>
    %123 = vector.shape_cast %122 : vector<1x8x288xf32> to vector<8x288xf32>
    %124 = vector.broadcast %0 : vector<1x288xf32> to vector<8x288xf32>
    %125 = arith.mulf %121, %124 : vector<8x288xf32>
    %cst_103 = arith.constant dense<0.000000e+00> : vector<8xf32>
    %126 = vector.multi_reduction <add>, %125, %cst_103 [1] : vector<8x288xf32> to vector<8xf32>
    %127 = vector.shape_cast %126 : vector<8xf32> to vector<8x1xf32>
    %128 = arith.mulf %125, %121 : vector<8x288xf32>
    %cst_104 = arith.constant dense<0.000000e+00> : vector<8xf32>
    %129 = vector.multi_reduction <add>, %128, %cst_104 [1] : vector<8x288xf32> to vector<8xf32>
    %130 = vector.shape_cast %129 : vector<8xf32> to vector<8x1xf32>
    %cst_105 = arith.constant 3.906250e-03 : f32
    %131 = vector.broadcast %cst_105 : f32 to vector<8x1xf32>
    %132 = arith.mulf %127, %131 : vector<8x1xf32>
    %cst_106 = arith.constant 3.906250e-03 : f32
    %133 = vector.broadcast %cst_106 : f32 to vector<8x1xf32>
    %134 = arith.mulf %130, %133 : vector<8x1xf32>
    %135 = arith.mulf %132, %132 : vector<8x1xf32>
    %136 = arith.subf %134, %135 : vector<8x1xf32>
    %137 = vector.broadcast %132 : vector<8x1xf32> to vector<8x288xf32>
    %138 = arith.subf %121, %137 : vector<8x288xf32>
    %cst_107 = arith.constant 9.99999974E-6 : f32
    %139 = vector.broadcast %cst_107 : f32 to vector<8x1xf32>
    %140 = arith.addf %136, %139 : vector<8x1xf32>
    %141 = math.rsqrt %140 : vector<8x1xf32>
    %142 = vector.broadcast %141 : vector<8x1xf32> to vector<8x288xf32>
    %143 = arith.mulf %138, %142 : vector<8x288xf32>
    %144 = arith.addf %123, %143 : vector<8x288xf32>
    %c0_108 = arith.constant 0 : index
    %c0_109 = arith.constant 0 : index
    %c0_110 = arith.constant 0 : index
    %145 = vector.load %arg7[%c0_108, %c0_109, %c0_110] : memref<1x8x288xf32, #tpu.memory_space<vmem>>, vector<1x8x288xf32>
    %146 = vector.shape_cast %145 : vector<1x8x288xf32> to vector<8x288xf32>
    %147 = vector.shape_cast %144 : vector<8x288xf32> to vector<1x8x288xf32>
    tpu.vector_store %arg7[%c0_108, %c0_109, %c0_110], %147 {strides = array<i32>} : memref<1x8x288xf32, #tpu.memory_space<vmem>>, vector<1x8x288xf32>,
    return
  }
  func.func @transform_0(%arg0: i32) -> (i32, i32, i32) {
    %c0_i32 = arith.constant 0 : i32
    %c0_i32_0 = arith.constant 0 : i32
    %c0_i32_1 = arith.constant 0 : i32
    return %arg0, %c0_i32, %c0_i32_0 : i32, i32, i32
  }
  func.func @transform_1(%arg0: i32) -> (i32, i32) {
    %c0_i32 = arith.constant 0 : i32
    %c0_i32_0 = arith.constant 0 : i32
    %c0_i32_1 = arith.constant 0 : i32
    return %c0_i32, %c0_i32_0 : i32, i32
  }
  func.func @transform_2(%arg0: i32) -> (i32, i32) {
    %c0_i32 = arith.constant 0 : i32
    %c0_i32_0 = arith.constant 0 : i32
    %c0_i32_1 = arith.constant 0 : i32
    return %c0_i32, %c0_i32_0 : i32, i32
  }
  func.func @transform_3(%arg0: i32) -> (i32, i32) {
    %c0_i32 = arith.constant 0 : i32
    %c0_i32_0 = arith.constant 0 : i32
    %c0_i32_1 = arith.constant 0 : i32
    return %c0_i32, %c0_i32_0 : i32, i32
  }
  func.func @transform_4(%arg0: i32) -> (i32, i32, i32) {
    %c0_i32 = arith.constant 0 : i32
    %c0_i32_0 = arith.constant 0 : i32
    %c0_i32_1 = arith.constant 0 : i32
    return %arg0, %c0_i32, %c0_i32_0 : i32, i32, i32
  }
  func.func @transform_5(%arg0: i32) -> (i32, i32, i32) {
    %c0_i32 = arith.constant 0 : i32
    %c0_i32_0 = arith.constant 0 : i32
    %c0_i32_1 = arith.constant 0 : i32
    return %arg0, %c0_i32, %c0_i32_0 : i32, i32, i32
  }
  func.func @transform_6(%arg0: i32) -> (i32, i32, i32) {
    %c0_i32 = arith.constant 0 : i32
    %c0_i32_0 = arith.constant 0 : i32
    %c0_i32_1 = arith.constant 0 : i32
    return %arg0, %c0_i32, %c0_i32_0 : i32, i32, i32
  }
}

</mosaic_0001>

<bundles_post_ra>
// kernel: g_residual_block.1
= control target key start
LH: loop header
LB: loop body
LE: loop exit
PB: predicated region body
PF: predicated region fallthrough
CT: control target
= control target key end

     0   :  { %s1522_s21 = smov 0   ;;  %s1737_s0 = inlined_call_operand.vmem [shape: bf16[2,8,326], index: 0, kind: input, shape index: {}]   ;;  %s1738_s1 = inlined_call_operand.vmem [shape: bf16[8,72], index: 1, kind: input, shape index: {}]   ;;  %s1739_s2 = inlined_call_operand.vmem [shape: bf16[8,72], index: 2, kind: input, shape index: {}]   ;;  %s1740_s3 = inlined_call_operand.vmem [shape: f32[1,288], index: 3, kind: input, shape index: {}]   ;;  %s1741_s4 = inlined_call_operand.vmem [shape: bf16[2,8,288], index: 4, kind: input, shape index: {}]   ;;  %s1742_s5 = inlined_call_operand.vmem [shape: f32[2,8,288], index: 5, kind: input, shape index: {}, may-alias: {5,6}]   ;;  %s1743_s6 = inlined_call_operand.vmem [shape: f32[2,8,288], index: 6, kind: output, shape index: {}, may-alias: {5,6}]  }
   0x1 LB: > { %s1316_s22 = sadd.s32 4294967295, %s1464_s21   ;;  %p1320_p0 = scmp.ge.s32.totalorder %s1464_s21, 1  ;;  %s1464_s21 = sphi %s1522_s21, %s16_s21  }
   0x2   : > { %p232_p1 = scmp.lt.s32.totalorder %s1464_s21, 3 }
   0x4   : > { %p233_p2 = pnand %p1320_p0, %p232_p1 }
   0x5   : > { %p272_p3 = scmp.lt.s32.totalorder (!%p233_p2), %s1316_s22, 1  ;;  %v1466_v1 = vmov (!%p233_p2), 0.0   ;;  %s1467_s27 = smov (!%p233_p2), 126   ;;  %vm1749_vm0 = vcmask (!%p233_p2), 257024   ;;  %v1474_v11 = vmov (!%p233_p2), 0   ;;  %vm1475_vm1 = vmmov (!%p233_p2), 0  }
   0x6   : > { %236 = sbr.rel (%p233_p2) target bundleno = 1720 (0x6b8), region = 44  ;;  %1379 = vmatprep.subr.bf16.mxu1 (!%p233_p2), %v1466_v1  ;;  %s1468_s28 = smov (!%p233_p2), 127   ;;  %575 = vmatprep.mubr.bf16.mxu0 (!%p233_p2), %v1474_v11  ;;  %vm311_vm2 = vcmask (!%p233_p2), 1043456   ;;  %vm313_vm3 = vcmask (!%p233_p2), 1039360   ;;  %vm1748_vm4 = vcmask (!%p233_p2), 1031168   ;;  %vm347_vm5 = vcmask (!%p233_p2), 900096  }
   0x7   : > { %s1469_s29 = smov (!%p233_p2), 110   ;;  %s1470_s30 = smov (!%p233_p2), 109   ;;  %1389 = vmatprep.mubr.msk.bf16.mxu1 (!%p233_p2), %vm1475_vm1, %v1466_v1  ;;  %vm364_vm6 = vcmask (!%p233_p2), 891904   ;;  %vm1747_vm7 = vcmask (!%p233_p2), 883712   ;;  %vm398_vm8 = vcmask (!%p233_p2), 752640   ;;  %vm415_vm9 = vcmask (!%p233_p2), 744448  }
   0x8   : > { %s1471_s7 = smov (!%p233_p2), 108   ;;  %s1472_s8 = smov (!%p233_p2), 92   ;;  %vm1746_vm10 = vcmask (!%p233_p2), 736256   ;;  %vm1745_vm11 = vcmask (!%p233_p2), 588800   ;;  %vm1744_vm12 = vcmask (!%p233_p2), 261120   ;;  %vm701_vm13 = vcmask (!%p233_p2), 1043624  }
   0x9   : > { %s1473_s9 = smov (!%p233_p2), 91   ;;  %s1476_s10 = smov (!%p233_p2), 90   ;;  %vm702_vm14 = vcmask (!%p233_p2), 1047556  }
   0xa   : > { %s1477_s18 = smov (!%p233_p2), 21   ;;  %s1478_s19 = smov (!%p233_p2), 36  }
   0xb   : > { %s1479_s20 = smov (!%p233_p2), 4   ;;  %s1481_s24 = smov (!%p233_p2), 124  }
   0xc   : > { %s1482_s25 = smov (!%p233_p2), 125  }
   0xd   : > { %s1772_s22 = smov (!%p272_p3, %s1316_s22), 1 }
   0xe   : > { %s1407_s23 = smul.u32 12, %s1772_s22 }
  0x10   : > { %s1538_s26 = scalar_lea.vmem %s1737_s0, %s1407_s23  ;;  %s281_s17 = scalar_lea.vmem %s1741_s4, %s1407_s23 }
  0x11   : > { %v1541_v0 = vld [vmem:[%s1538_s26] sm:$0xff]  ;;  %v320_v2 = vld [vmem:[%s1538_s26 + $0x8] sm:$0xf]  ;;  %s1480_s23 = smov 2  }
  0x12   : > { %323 = vrot.lane.b32.xlu1 %v1541_v0, %s1467_s27  ;;  %305 = vrot.lane.b32.xlu0 %v1541_v0, %s1468_s28  ;;  %v302_v3 = vld [vmem:[%s1538_s26 + $0x8] sm:$0xf] }
  0x13   : > { %v297_v4 = vld [vmem:[%s1538_s26 + $0x8] sm:$0xf] }
  0x14   : > { %300 = vst.msk [vmem:[#allocation3 + $0x8] sm:$0xf] %vm1749_vm0, %v297_v4  ;;  %v337_v5 = vld [vmem:[%s1538_s26 + $0x8] sm:$0xf] }
  0x15   : > { %v354_v6 = vld [vmem:[%s1538_s26 + $0x8] sm:$0xf] }
  0x16   : > { %325 = vrot.lane.b32.xlu1 %v320_v2, %s1467_s27  ;;  %307 = vrot.lane.b32.xlu0 %v302_v3, %s1468_s28  ;;  %v371_v7 = vld [vmem:[%s1538_s26 + $0x8] sm:$0xf]  ;;  %s1485_s28 = smov 89  }
  0x17   : > { %v388_v8 = vld [vmem:[%s1538_s26 + $0x8] sm:$0xf] }
  0x18   : > { %v405_v9 = vld [vmem:[%s1538_s26 + $0x8] sm:$0xf] }
  0x19   : > { %v422_v10 = vld [vmem:[%s1538_s26 + $0x8] sm:$0xf]  ;;  %s1483_s26 = smov 107  }
  0x1a   : > { %342 = vrot.lane.b32.xlu1 %v337_v5, %s1469_s29  ;;  %340 = vrot.lane.b32.xlu0 %v1541_v0, %s1469_s29  ;;  %s1486_s29 = smov 88  }
  0x1e   : > { %359 = vrot.lane.b32.xlu1 %v354_v6, %s1470_s30  ;;  %357 = vrot.lane.b32.xlu0 %v1541_v0, %s1470_s30 }
  0x22   : > { %376 = vrot.lane.b32.xlu1 %v371_v7, %s1471_s7  ;;  %374 = vrot.lane.b32.xlu0 %v1541_v0, %s1471_s7 }
  0x26   : > { %393 = vrot.lane.b32.xlu1 %v388_v8, %s1472_s8  ;;  %391 = vrot.lane.b32.xlu0 %v1541_v0, %s1472_s8 }
  0x2a   : > { %410 = vrot.lane.b32.xlu1 %v405_v9, %s1473_s9  ;;  %408 = vrot.lane.b32.xlu0 %v1541_v0, %s1473_s9 }
  0x2e   : > { %427 = vrot.lane.b32.xlu1 %v422_v10, %s1476_s10  ;;  %425 = vrot.lane.b32.xlu0 %v1541_v0, %s1476_s10 }
  0x84   : > { %v324_v12 = vpop.permute.xlu1 %323  ;;  %v306_v13 = vpop.permute.xlu0 %305 }
  0x85   : > { %v309_v16 = vrot.slane %v306_v13, 4  ;;  %v327_v19 = vrot.slane %v324_v12, 4 }
  0x88   : > { %v326_v14 = vpop.permute.xlu1 %325  ;;  %v308_v15 = vpop.permute.xlu0 %307 }
  0x89   : > { %v328_v17 = vrot.slane %v326_v14, 4  ;;  %335 = vst.msk [vmem:[#allocation3 + $0x20] sm:$0xf] %vm1749_vm0, %v326_v14  ;;  %v310_v18 = vrot.slane %v308_v15, 4  ;;  %318 = vst.msk [vmem:[#allocation3 + $0x14] sm:$0xf] %vm1749_vm0, %v308_v15 }
  0x8b   : > { %v312_v20 = vsel %vm311_vm2, %v309_v16, %v310_v18  ;;  %v329_v21 = vsel %vm311_vm2, %v327_v19, %v328_v17  ;;  %v625_v16 = vlaneseq  ;;  %v295_v19 = vld [vmem:[%s1740_s3] sm:$0x7] }
  0x8c   : > { %v314_v22 = vsel %vm313_vm3, %v306_v13, %v312_v20  ;;  %v343_v23 = vpop.permute.xlu1 %342  ;;  %v341_v24 = vpop.permute.xlu0 %340  ;;  %v331_v30 = vsel %vm1748_vm4, %v324_v12, %v329_v21  ;;  %v438_v13 = vld [vmem:[%s1738_s1] sm:$0xf] }
  0x8d   : > { %v345_v25 = vrot.slane %v343_v23, 4  ;;  %352 = vst.msk [vmem:[#allocation3 + $0x2c] sm:$0xf] %vm1749_vm0, %v343_v23  ;;  %v344_v26 = vrot.slane %v341_v24, 4  ;;  %v1326_v27 = vcombine.high %v1541_v0, %v314_v22  ;;  %v1325_v28 = vcombine.low %v1541_v0, %v314_v22 }
  0x8e   : > { %v626_v17 = vshrl.u32 %v625_v16, 7 }
  0x8f   : > { %v346_v29 = vsel %vm311_vm2, %v344_v26, %v345_v25  ;;  %543 = vmatprep.subr.bf16.mxu0 %v1326_v27 }
  0x90   : > { %v348_v31 = vsel %vm347_vm5, %v341_v24, %v346_v29  ;;  %v360_v32 = vpop.permute.xlu1 %359  ;;  %v358_v33 = vpop.permute.xlu0 %357  ;;  %v1444_v34 = vld [vmem:[#allocation3 + $0x8] ss:$12 sps:$4 sm:$0xff]   ;;  %544 = vmatpush1.bf16.msra.mxu0 %v1325_v28  ;;  %v627_v18 = vsub.s32 0, %v626_v17  ;;  %v631_v20 = vsub.s32 1, %v626_v17  ;;  %v635_v21 = vsub.s32 2, %v626_v17 }
  0x91   : > { %v362_v35 = vrot.slane %v360_v32, 4  ;;  %369 = vst.msk [vmem:[#allocation3 + $0x38] sm:$0xf] %vm1749_vm0, %v360_v32  ;;  %v361_v36 = vrot.slane %v358_v33, 4  ;;  %v1329_v37 = vcombine.high %v331_v30, %v348_v31  ;;  %v1328_v38 = vcombine.low %v331_v30, %v348_v31  ;;  %1380 = vmatpush3.bf16.msra.mxu1 %v1444_v34 }
  0x92   : > { %1381 = vmatprep.subr.bf16.mxu1 %v1466_v1  ;;  %v1614_v22 = vrot.slane %v295_v19, %v627_v18  ;;  %v1616_v23 = vrot.slane %v295_v19, %v631_v20  ;;  %v1618_v24 = vrot.slane %v295_v19, %v635_v21 }
  0x93   : > { %545 = vmatprep.subr.bf16.mxu0 %v1329_v37  ;;  %v363_v42 = vsel %vm311_vm2, %v361_v36, %v362_v35 }
  0x94   : > { %v377_v39 = vpop.permute.xlu1 %376  ;;  %v375_v40 = vpop.permute.xlu0 %374  ;;  %v1445_v41 = vld [vmem:[#allocation3 + $0x20] ss:$12 sps:$4 sm:$0xff]   ;;  %546 = vmatpush1.bf16.msra.mxu0 %v1328_v38  ;;  %v365_v46 = vsel %vm364_vm6, %v358_v33, %v363_v42  ;;  %vm1647_vm6 = vmor %vm702_vm14, %vm701_vm13 }
  0x95   : > { %v379_v43 = vrot.slane %v377_v39, 4  ;;  %386 = vst.msk [vmem:[#allocation3 + $0x44] sm:$0xf] %vm1749_vm0, %v377_v39  ;;  %v378_v44 = vrot.slane %v375_v40, 4  ;;  %1382 = vmatpush3.bf16.msra.mxu1 %v1445_v41 }
  0x96   : > { %1383 = vmatprep.subr.bf16.mxu1 %v1466_v1 }
  0x97   : > { %v380_v45 = vsel %vm311_vm2, %v378_v44, %v379_v43 }
  0x98   : > { %v382_v47 = vsel %vm1747_vm7, %v375_v40, %v380_v45  ;;  %v394_v48 = vpop.permute.xlu1 %393  ;;  %v392_v49 = vpop.permute.xlu0 %391 }
  0x99   : > { %v396_v50 = vrot.slane %v394_v48, 4  ;;  %403 = vst.msk [vmem:[#allocation3 + $0x50] sm:$0xf] %vm1749_vm0, %v394_v48  ;;  %v395_v51 = vrot.slane %v392_v49, 4  ;;  %v1332_v52 = vcombine.high %v365_v46, %v382_v47  ;;  %v1331_v53 = vcombine.low %v365_v46, %v382_v47 }
  0x9b   : > { %547 = vmatprep.subr.bf16.mxu0 %v1332_v52  ;;  %v397_v57 = vsel %vm311_vm2, %v395_v51, %v396_v50  ;;  %v672_v52 = vld [vmem:[%s281_s17] sm:$0xff] }
  0x9c   : > { %v411_v54 = vpop.permute.xlu1 %410  ;;  %v409_v55 = vpop.permute.xlu0 %408  ;;  %v1446_v56 = vld [vmem:[#allocation3 + $0x38] ss:$12 sps:$4 sm:$0xff]   ;;  %548 = vmatpush1.bf16.msra.mxu0 %v1331_v53  ;;  %v399_v61 = vsel %vm398_vm8, %v392_v49, %v397_v57  ;;  %v673_v53 = vld [vmem:[%s281_s17 + $0x8] sm:$0xf] }
  0x9d   : > { %v413_v58 = vrot.slane %v411_v54, 4  ;;  %420 = vst.msk [vmem:[#allocation3 + $0x5c] sm:$0xf] %vm1749_vm0, %v411_v54  ;;  %v412_v59 = vrot.slane %v409_v55, 4  ;;  %1384 = vmatpush3.bf16.msra.mxu1 %v1446_v56 }
  0x9e   : > { %1385 = vmatprep.subr.bf16.mxu1 %v1466_v1 }
  0x9f   : > { %v414_v60 = vsel %vm311_vm2, %v412_v59, %v413_v58  ;;  %v676_v58 = vunpack.c.l.bf16 %v673_v53  ;;  %v674_v59 = vunpack.c.l.bf16 %v672_v52 }
  0xa0   : > { %v416_v62 = vsel %vm415_vm9, %v409_v55, %v414_v60  ;;  %v428_v63 = vpop.permute.xlu1 %427  ;;  %v426_v0 = vpop.permute.xlu0 %425  ;;  %vm696_vm9 = vcmask 171008  }
  0xa1   : > { %v430_v2 = vrot.slane %v428_v63, 4  ;;  %437 = vst.msk [vmem:[#allocation3 + $0x68] sm:$0xf] %vm1749_vm0, %v428_v63  ;;  %v429_v3 = vrot.slane %v426_v0, 4  ;;  %v1335_v4 = vcombine.high %v399_v61, %v416_v62  ;;  %v1334_v5 = vcombine.low %v399_v61, %v416_v62 }
  0xa2   : > { %v675_v63 = vunpack.c.h.bf16 %v672_v52 }
  0xa3   : > { %v431_v6 = vsel %vm311_vm2, %v429_v3, %v430_v2  ;;  %549 = vmatprep.subr.bf16.mxu0 %v1335_v4 }
  0xa4   : > { %v433_v7 = vsel %vm1746_vm10, %v426_v0, %v431_v6  ;;  %v1447_v8 = vld [vmem:[#allocation3 + $0x50] ss:$12 sps:$4 sm:$0xff]   ;;  %550 = vmatpush1.bf16.msra.mxu0 %v1334_v5 }
  0xa5   : > { %v1338_v9 = vcombine.high %v433_v7, %v433_v7  ;;  %v1337_v10 = vcombine.low %v433_v7, %v433_v7  ;;  %1386 = vmatpush3.bf16.msra.mxu1 %v1447_v8 }
  0xa6   : > { %1387 = vmatprep.subr.bf16.mxu1 %v1466_v1 }
  0xa7   : > { %1340 = vmatprep.subr.msk.bf16.mxu0 %vm311_vm2, %v1338_v9  ;;  %v535_v12 = vsel %vm311_vm2, %v1337_v10, 0  ;;  %v724_v9 = vand.u32 127, %v625_v16 }
  0xa8   : > { %v1448_v14 = vld [vmem:[#allocation3 + $0x68] ss:$0 sps:$4 sm:$0xff]   ;;  %552 = vmatpush1.bf16.msra.mxu0 %v535_v12 }
  0xa9   : > { %v541_v15 = vsel %vm311_vm2, %v1448_v14, 0  ;;  %v725_v10 = vadd.s32 128, %v724_v9  ;;  %v1637_v17 = vadd.s32 256, %v724_v9 }
  0xaa   : > { %1388 = vmatpush3.bf16.msra.mxu1 %v541_v15 }
  0xab   : > { %1341 = vmatmul.mubr.msk.bf16.vlgmr.msra.gmra.mrb[0].mxu0 %vm1745_vm11, %v438_v13  ;;  %1393 = vmatprep.subr.bf16.mxu1 %v1466_v1  ;;  %v1634_v14 = vmul.u32.u64.low 3817748708, %v725_v10  ;;  %v1635_v15 = vmul.u32.u64.high 3817748708, %v725_v10, %v1634_v14  ;;  %v1642_v20 = vmul.u32.u64.low 3817748708, %v1637_v17  ;;  %v1643_v21 = vmul.u32.u64.high 3817748708, %v1637_v17, %v1642_v20 }
  0xac   : > { %1151 = vmatprep.mubr.bf16.mxu0 %v1474_v11 }
  0xad   : > { %1390 = vmatmul.mubr.msk.bf16.vlgmr.msra.gmra.mrb[0].mxu1 %vm1745_vm11, %v438_v13  ;;  %v1631_v12 = vmul.u32.u64.low 3817748708, %v724_v9  ;;  %v1632_v13 = vmul.u32.u64.high 3817748708, %v724_v9, %v1631_v12  ;;  %v744_v19 = vshrl.u32 %v1635_v15, 4  ;;  %vm705_vm11 = vcmask 429056  }
  0xae   : > { %1403 = vmatprep.mubr.msk.bf16.mxu1 %vm1475_vm1, %v1466_v1 }
  0xaf   : > { %v733_v18 = vshrl.u32 %v1632_v13, 4 }
 0x17e   : > { %v577_v25 = vpop.f32.mrb[0].mxu0 }
 0x17f   : > { %v640_v26 = vmul.f32 %v1614_v22, %v577_v25  ;;  %v579_v27 = vpop.f32.mrb[1].mxu0 }
 0x180   : > { %v641_v28 = vmul.f32 %v1616_v23, %v579_v27  ;;  %v581_v29 = vpop.f32.mrb[2].mxu0  ;;  %v618_v30 = vpop.f32.mrb[0].mxu1 }
 0x181   : > { %v649_v31 = vmul.f32 %v640_v26, %v577_v25  ;;  %v582_v32 = vpop.f32.mrb[3].mxu0  ;;  %v642_v33 = vmul.f32 %v1618_v24, %v618_v30  ;;  %v1391_v34 = vpop.f32.mrb[1].mxu1 }
 0x182   : > { %v650_v35 = vmul.f32 %v641_v28, %v579_v27  ;;  %v643_v36 = vadd.f32 %v641_v28, %v640_v26  ;;  %v621_v37 = vpop.f32.mrb[2].mxu1  ;;  %v745_v26 = vmul.u32 18, %v744_v19  ;;  %v755_v28 = vshrl.u32 %v1643_v21, 4 }
 0x183   : > { %v651_v38 = vmul.f32 %v642_v33, %v618_v30  ;;  %v1392_v39 = vpop.f32.mrb[3].mxu1  ;;  %v645_v40 = vsel %vm1744_vm12, %v642_v33, 0.0 }
 0x184   : > { %v652_v41 = vadd.f32 %v650_v35, %v649_v31  ;;  %v646_v42 = vadd.f32 %v645_v40, %v643_v36 }
 0x185   : > { %v653_v43 = vsel %vm1744_vm12, %v651_v38, 0.0 }
 0x186   : > { %647 = vadd.xlane.f32.xlu0 %v646_v42  ;;  %v654_v44 = vadd.f32 %v653_v43, %v652_v41 }
 0x188   : > { %655 = vadd.xlane.f32.xlu1 %v654_v44 }
 0x213   : > { %v648_v45 = vpop.xlane.xlu0 %647 }
 0x214   : > { %v657_v46 = vmul.f32 0.00390625, %v648_v45 }
 0x215   : > { %v656_v47 = vpop.xlane.xlu1 %655 }
 0x216   : > { %v658_v48 = vmul.f32 0.00390625, %v656_v47  ;;  %v659_v49 = vmul.f32 %v657_v46, %v657_v46  ;;  %v661_v54 = vsub.f32 %v577_v25, %v657_v46  ;;  %v662_v55 = vsub.f32 %v579_v27, %v657_v46 }
 0x217   : > { %v663_v56 = vsub.f32 %v618_v30, %v657_v46  ;;  %v734_v25 = vmul.u32 18, %v733_v18  ;;  %v746_v27 = vsub.s32 %v725_v10, %v745_v26  ;;  %v756_v30 = vmul.u32 18, %v755_v28 }
 0x218   : > { %v660_v50 = vsub.f32 %v658_v48, %v659_v49 }
 0x219   : > { %v735_v16 = vsub.s32 %v724_v9, %v734_v25  ;;  %vm761_vm3 = vcmp.ne.s32.totalorder %v746_v27, 0  ;;  %vm764_vm8 = vcmp.lt.s32.totalorder %v746_v27, 0  ;;  %v770_v33 = vadd.s32 18, %v746_v27 }
 0x21a   : > { %v664_v51 = vadd.f32 1e-05, %v660_v50  ;;  %vm767_vm10 = vmand %vm764_vm8, %vm761_vm3  ;;  %v757_v35 = vsub.s32 %v1637_v17, %v756_v30 }
 0x21b   : > { %vm760_vm15 = vcmp.ne.s32.totalorder %v735_v16, 0  ;;  %vm763_vm5 = vcmp.lt.s32.totalorder %v735_v16, 0  ;;  %v769_v32 = vadd.s32 18, %v735_v16  ;;  %v773_v40 = vsel %vm767_vm10, %v770_v33, %v746_v27 }
 0x21c   : > { %1454 = vrsqrt.f32 %v664_v51  ;;  %vm766_vm12 = vmand %vm763_vm5, %vm760_vm15  ;;  %vm762_vm7 = vcmp.ne.s32.totalorder %v757_v35, 0  ;;  %vm765_vm13 = vcmp.lt.s32.totalorder %v757_v35, 0  ;;  %v771_v41 = vadd.s32 18, %v757_v35 }
 0x21d   : > { %v772_v39 = vsel %vm766_vm12, %v769_v32, %v735_v16  ;;  %vm768_vm15 = vmand %vm765_vm13, %vm762_vm7  ;;  %vm776_vm4 = vcmp.eq.s32.totalorder %v773_v40, 0  ;;  %vm719_vm7 = vcmask 568736   ;;  %vm712_vm10 = vcmask 158736  }
 0x21e   : > { %vm775_vm5 = vcmp.eq.s32.totalorder %v772_v39, 0  ;;  %v774_v42 = vsel %vm768_vm15, %v771_v41, %v757_v35  ;;  %vm793_vm12 = vcmask 31744  }
 0x21f   : > { %vm784_vm0 = vmpackc.low %vm776_vm4, %vm775_vm5  ;;  %vm777_vm3 = vcmp.eq.s32.totalorder %v774_v42, 0  ;;  %vm813_vm4 = vcmp.eq.s32.totalorder %v773_v40, 17  ;;  %vm814_vm15 = vcmp.eq.s32.totalorder %v774_v42, 17  ;;  %vm840_vm5 = vcmp.ge.s32.totalorder %v1637_v17, 324 }
 0x220   : > { %v786_v45 = vsel %vm784_vm0, 65537, %v1474_v11  ;;  %vm785_vm8 = vmpackc.low %vm777_vm3, %vm777_vm3  ;;  %vm812_vm0 = vcmp.eq.s32.totalorder %v772_v39, 17 }
 0x221   : > { %v787_v46 = vsel %vm785_vm8, 65537, %v1474_v11  ;;  %vm822_vm3 = vmpackc.low %vm814_vm15, %vm814_vm15  ;;  %vm1759_vm15 = vcmask 883712  }
 0x222   : > { %vm848_vm8 = vmpackc.low %vm840_vm5, %vm840_vm5  ;;  %vm943_vm5 = vcmask 875520  }
 0x226   : > { %v1455_v57 = vpop.eup %1454 }
 0x227   : > { %v668_v60 = vmul.f32 %v1455_v57, %v663_v56  ;;  %v666_v61 = vmul.f32 %v1455_v57, %v661_v54  ;;  %v667_v62 = vmul.f32 %v1455_v57, %v662_v55 }
 0x229   : > { %v671_v0 = vmax.f32 %v668_v60, 0.0  ;;  %v669_v2 = vmax.f32 %v666_v61, 0.0  ;;  %v670_v3 = vmax.f32 %v667_v62, 0.0 }
 0x22b   : > { %v679_v4 = vmul.f32 %v676_v58, %v671_v0  ;;  %v677_v5 = vmul.f32 %v674_v59, %v669_v2  ;;  %v678_v6 = vmul.f32 %v675_v63, %v670_v3 }
 0x22d   : > { %v1366_v7 = vpack.c.bf16 %v679_v4, %v679_v4  ;;  %v1365_v8 = vpack.c.bf16 %v678_v6, %v677_v5 }
 0x22f   : > { %693 = vrot.lane.b32.xlu1 %v1366_v7, %s1477_s18  ;;  %691 = vrot.lane.b32.xlu0 %v1365_v8, %s1477_s18 }
 0x2a1   : > { %v692_v31 = vpop.permute.xlu0 %691  ;;  %v694_v36 = vpop.permute.xlu1 %693 }
 0x2a2   : > { %v695_v34 = vrot.slane %v692_v31, 4 }
 0x2a4   : > { %v697_v37 = vsel %vm696_vm9, %v695_v34, %v692_v31  ;;  %v698_v38 = vsel %vm696_vm9, %v695_v34, %v694_v36 }
 0x2a5   : > { %704 = vst.msk [vmem:[#allocation2] sm:$0xff] %vm1647_vm6, %v697_v37  ;;  %vm805_vm6 = vcmask 15360  }
 0x2a6   : > { %706 = vst.msk [vmem:[#allocation2 + $0x8] sm:$0xf] %vm705_vm11, %v698_v38  ;;  %vm1659_vm11 = vmpackc.low %vm813_vm4, %vm812_vm0  ;;  %vm862_vm0 = vcmask 1043472  }
 0x2a7   : > { %vm863_vm4 = vmor %vm702_vm14, %vm862_vm0  ;;  %vm1755_vm14 = vcmask 1031168   ;;  %vm1763_vm0 = vcmask 736256  }
 0x2ac   : > { %v707_v44 = vld [vmem:[#allocation2] sm:$0xf] }
 0x2ad   : > { %v714_v43 = vld [vmem:[#allocation2 + $0x8] sm:$0xf]  ;;  %709 = vrot.lane.b32.xlu0 %v707_v44, %s1472_s8  ;;  %s1408_s8 = smul.u32 24, %s1772_s22 }
 0x2ae   : > { %716 = vrot.lane.b32.xlu1 %v714_v43, %s1478_s19 }
 0x2af   : > { %s286_s11 = scalar_lea.vmem %s1742_s5, %s1408_s8  ;;  %s291_s14 = scalar_lea.vmem %s1743_s6, %s1408_s8 }
 0x2b1   : > { %788 = vrot.lane.b32.xlu0 %v786_v45, %s1479_s20 }
 0x2b5   : > { %790 = vrot.lane.b32.xlu0 %v787_v46, %s1479_s20 }
 0x31f   : > { %v710_v48 = vpop.permute.xlu0 %709 }
 0x320   : > { %v717_v47 = vpop.permute.xlu1 %716  ;;  %713 = vst.msk [vmem:[#allocation2] sm:$0xf] %vm712_vm10, %v710_v48  ;;  %vm847_vm10 = vmpackc.low %vm1475_vm1, %vm1475_vm1  ;;  %vm1754_vm1 = vcmask 257024  }
 0x321   : > { %720 = vst.msk [vmem:[#allocation2 + $0x8] sm:$0xf] %vm719_vm7, %v717_v47  ;;  %vm832_vm7 = vcmask 1014784  }
 0x323   : > { %v789_v51 = vpop.permute.xlu0 %788 }
 0x324   : > { %v792_v52 = vrot.slane %v789_v51, 4 }
 0x326   : > { %v794_v54 = vsel %vm793_vm12, %v792_v52, %v789_v51 }
 0x327   : > { %v721_v49 = vld [vmem:[#allocation2] sm:$0xff]  ;;  %v791_v53 = vpop.permute.xlu0 %790  ;;  %vm796_vm9 = vcmp.ne.s16.totalorder %v794_v54, 0 }
 0x328   : > { %800 = vrot.lane.b32.xlu1 %v721_v49, %s1480_s23  ;;  %v722_v50 = vld [vmem:[#allocation2 + $0x8] sm:$0xf]  ;;  %v795_v57 = vsel %vm793_vm12, %v792_v52, %v791_v53  ;;  %vm865_vm12 = vcmask 584704  }
 0x329   : > { %vm797_vm13 = vcmp.ne.s16.totalorder %v795_v57, 0 }
 0x32c   : > { %802 = vrot.lane.b32.xlu1 %v722_v50, %s1480_s23 }
 0x39a   : > { %v801_v55 = vpop.permute.xlu1 %800 }
 0x39b   : > { %v804_v56 = vrot.slane %v801_v55, 4 }
 0x39d   : > { %v806_v58 = vsel %vm805_vm6, %v804_v56, %v801_v55 }
 0x39e   : > { %v803_v59 = vpop.permute.xlu1 %802  ;;  %v810_v60 = vsel %vm796_vm9, %v721_v49, %v806_v58  ;;  %vm1757_vm9 = vmmov %vm1754_vm1 }
 0x39f   : > { %v807_v61 = vsel %vm805_vm6, %v804_v56, %v803_v59  ;;  %825 = vrot.lane.b32.xlu0 %v810_v60, %s1481_s24 }
 0x3a0   : > { %v811_v62 = vsel %vm797_vm13, %v722_v50, %v807_v61  ;;  %vm1758_vm13 = vmmov %vm1754_vm1 }
 0x3a1   : > { %827 = vrot.lane.b32.xlu1 %v811_v62, %s1481_s24 }
 0x411   : > { %v826_v63 = vpop.permute.xlu0 %825 }
 0x412   : > { %v829_v2 = vrot.slane %v826_v63, 4 }
 0x413   : > { %v828_v0 = vpop.permute.xlu1 %827 }
 0x414   : > { %v830_v3 = vrot.slane %v828_v0, 4  ;;  %v837_v4 = vsel %vm822_vm3, %v722_v50, %v828_v0  ;;  %vm1760_vm3 = vmmov %vm1754_vm1 }
 0x415   : > { %v850_v5 = vsel %vm848_vm8, 0, %v837_v4  ;;  %vm1761_vm8 = vmmov %vm1754_vm1 }
 0x416   : > { %v831_v6 = vsel %vm311_vm2, %v829_v2, %v830_v3  ;;  %855 = vrot.lane.b32.xlu1 %v850_v5, %s1480_s23 }
 0x417   : > { %v833_v7 = vsel %vm832_vm7, %v826_v63, %v831_v6 }
 0x418   : > { %v836_v8 = vsel %vm1659_vm11, %v721_v49, %v833_v7  ;;  %vm1756_vm11 = vmmov %vm1754_vm1 }
 0x419   : > { %v849_v9 = vsel %vm847_vm10, 0, %v836_v8  ;;  %vm1762_vm10 = vmmov %vm1754_vm1 }
 0x41a   : > { %853 = vrot.lane.b32.xlu0 %v849_v9, %s1480_s23 }
 0x488   : > { %v856_v13 = vpop.permute.xlu1 %855 }
 0x48c   : > { %v854_v10 = vpop.permute.xlu0 %853 }
 0x48d   : > { %v857_v12 = vrot.slane %v854_v10, 4 }
 0x48f   : > { %v858_v14 = vsel %vm805_vm6, %v857_v12, %v854_v10  ;;  %v859_v15 = vsel %vm805_vm6, %v857_v12, %v856_v13  ;;  %vm894_vm6 = vcmask 1022976  }
 0x490   : > { %864 = vst.msk [vmem:[#allocation2] sm:$0xff] %vm863_vm4, %v858_v14  ;;  %vm1764_vm4 = vmmov %vm1754_vm1 }
 0x491   : > { %866 = vst.msk [vmem:[#allocation2 + $0x8] sm:$0xf] %vm865_vm12, %v859_v15  ;;  %vm993_vm12 = vcmask 728064  }
 0x497   : > { %v867_v18 = vld [vmem:[#allocation2] sm:$0xff] }
 0x498   : > { %v868_v17 = vld [vmem:[#allocation2 + $0x8] sm:$0xf]  ;;  %871 = vrot.lane.b32.xlu0 %v867_v18, %s1467_s27 }
 0x499   : > { %873 = vrot.lane.b32.xlu1 %v868_v17, %s1467_s27  ;;  %v884_v19 = vld [vmem:[#allocation2 + $0x8] sm:$0xf]  ;;  %s1484_s27 = smov 106  }
 0x49a   : > { %v901_v20 = vld [vmem:[#allocation2 + $0x8] sm:$0xf] }
 0x49b   : > { %v917_v21 = vld [vmem:[#allocation2 + $0x8] sm:$0xf] }
 0x49c   : > { %887 = vrot.lane.b32.xlu0 %v867_v18, %s1482_s25  ;;  %v933_v25 = vld [vmem:[#allocation2 + $0x8] sm:$0xf] }
 0x49d   : > { %889 = vrot.lane.b32.xlu1 %v884_v19, %s1482_s25  ;;  %v950_v26 = vld [vmem:[#allocation2 + $0x8] sm:$0xf] }
 0x49e   : > { %v967_v16 = vld [vmem:[#allocation2 + $0x8] sm:$0xf] }
 0x49f   : > { %v983_v27 = vld [vmem:[#allocation2 + $0x8] sm:$0xf] }
 0x4a0   : > { %904 = vrot.lane.b32.xlu0 %v867_v18, %s1481_s24  ;;  %v1000_v28 = vld [vmem:[#allocation2 + $0x8] sm:$0xf] }
 0x4a1   : > { %906 = vrot.lane.b32.xlu1 %v901_v20, %s1481_s24 }
 0x4a4   : > { %920 = vrot.lane.b32.xlu0 %v867_v18, %s1471_s7 }
 0x4a5   : > { %922 = vrot.lane.b32.xlu1 %v917_v21, %s1471_s7 }
 0x4a8   : > { %936 = vrot.lane.b32.xlu0 %v867_v18, %s1483_s26 }
 0x4a9   : > { %938 = vrot.lane.b32.xlu1 %v933_v25, %s1483_s26 }
 0x4ac   : > { %953 = vrot.lane.b32.xlu0 %v867_v18, %s1484_s27 }
 0x4ad   : > { %955 = vrot.lane.b32.xlu1 %v950_v26, %s1484_s27 }
 0x4b0   : > { %970 = vrot.lane.b32.xlu0 %v867_v18, %s1476_s10 }
 0x4b1   : > { %972 = vrot.lane.b32.xlu1 %v967_v16, %s1476_s10 }
 0x4b4   : > { %986 = vrot.lane.b32.xlu0 %v867_v18, %s1485_s28 }
 0x4b5   : > { %988 = vrot.lane.b32.xlu1 %v983_v27, %s1485_s28 }
 0x4b8   : > { %1003 = vrot.lane.b32.xlu0 %v867_v18, %s1486_s29 }
 0x4b9   : > { %1005 = vrot.lane.b32.xlu1 %v1000_v28, %s1486_s29 }
 0x50a   : > { %v872_v30 = vpop.permute.xlu0 %871 }
 0x50b   : > { %v874_v29 = vpop.permute.xlu1 %873  ;;  %v875_v32 = vrot.slane %v872_v30, 4 }
 0x50c   : > { %v876_v31 = vrot.slane %v874_v29, 4  ;;  %882 = vst.msk [vmem:[#allocation3 + $0x8] sm:$0xf] %vm1754_vm1, %v874_v29  ;;  %vm1010_vm1 = vcmask 719872  }
 0x50e   : > { %v877_v33 = vsel %vm311_vm2, %v875_v32, %v876_v31  ;;  %v888_v36 = vpop.permute.xlu0 %887 }
 0x50f   : > { %v878_v34 = vsel %vm1755_vm14, %v872_v30, %v877_v33  ;;  %v890_v35 = vpop.permute.xlu1 %889  ;;  %v891_v38 = vrot.slane %v888_v36, 4  ;;  %vm1765_vm14 = vmmov %vm1760_vm3 }
 0x510   : > { %v892_v37 = vrot.slane %v890_v35, 4  ;;  %899 = vst.msk [vmem:[#allocation3 + $0x14] sm:$0xf] %vm1756_vm11, %v890_v35  ;;  %vm1766_vm11 = vcmask 588800  }
 0x512   : > { %v893_v39 = vsel %vm311_vm2, %v891_v38, %v892_v37  ;;  %v905_v42 = vpop.permute.xlu0 %904 }
 0x513   : > { %v895_v40 = vsel %vm894_vm6, %v888_v36, %v893_v39  ;;  %v907_v41 = vpop.permute.xlu1 %906  ;;  %v908_v44 = vrot.slane %v905_v42, 4  ;;  %v1016_v39 = vld [vmem:[%s1739_s2] sm:$0xf]  ;;  %vm1767_vm6 = vmmov %vm1766_vm11 }
 0x514   : > { %v909_v43 = vrot.slane %v907_v41, 4  ;;  %915 = vst.msk [vmem:[#allocation3 + $0x20] sm:$0xf] %vm1757_vm9, %v907_v41  ;;  %v1345_v45 = vcombine.low %v878_v34, %v895_v40  ;;  %v1346_v46 = vcombine.high %v878_v34, %v895_v40 }
 0x516   : > { %v910_v47 = vsel %vm311_vm2, %v908_v44, %v909_v43  ;;  %1119 = vmatprep.subr.bf16.mxu0 %v1346_v46  ;;  %v921_v50 = vpop.permute.xlu0 %920 }
 0x517   : > { %v911_v48 = vsel %vm832_vm7, %v905_v42, %v910_v47  ;;  %v923_v49 = vpop.permute.xlu1 %922  ;;  %v1449_v51 = vld [vmem:[#allocation3 + $0x8] ss:$12 sps:$4 sm:$0xff]   ;;  %1120 = vmatpush1.bf16.msra.mxu0 %v1345_v45  ;;  %v924_v11 = vrot.slane %v921_v50, 4  ;;  %vm960_vm7 = vcmask 867328  }
 0x518   : > { %v925_v52 = vrot.slane %v923_v49, 4  ;;  %931 = vst.msk [vmem:[#allocation3 + $0x2c] sm:$0xf] %vm1758_vm13, %v923_v49  ;;  %1394 = vmatpush3.bf16.msra.mxu1 %v1449_v51 }
 0x519   : > { %1395 = vmatprep.subr.bf16.mxu1 %v1466_v1 }
 0x51a   : > { %v926_v53 = vsel %vm311_vm2, %v924_v11, %v925_v52  ;;  %v937_v56 = vpop.permute.xlu0 %936 }
 0x51b   : > { %v927_v54 = vsel %vm1759_vm15, %v921_v50, %v926_v53  ;;  %v939_v55 = vpop.permute.xlu1 %938  ;;  %v940_v58 = vrot.slane %v937_v56, 4 }
 0x51c   : > { %v941_v57 = vrot.slane %v939_v55, 4  ;;  %948 = vst.msk [vmem:[#allocation3 + $0x38] sm:$0xf] %vm1760_vm3, %v939_v55  ;;  %v1348_v59 = vcombine.low %v911_v48, %v927_v54  ;;  %v1349_v60 = vcombine.high %v911_v48, %v927_v54 }
 0x51e   : > { %v942_v61 = vsel %vm311_vm2, %v940_v58, %v941_v57  ;;  %1121 = vmatprep.subr.bf16.mxu0 %v1349_v60  ;;  %v954_v0 = vpop.permute.xlu0 %953 }
 0x51f   : > { %v944_v62 = vsel %vm943_vm5, %v937_v56, %v942_v61  ;;  %v956_v63 = vpop.permute.xlu1 %955  ;;  %v1450_v2 = vld [vmem:[#allocation3 + $0x20] ss:$12 sps:$4 sm:$0xff]   ;;  %1122 = vmatpush1.bf16.msra.mxu0 %v1348_v59  ;;  %v957_v4 = vrot.slane %v954_v0, 4 }
 0x520   : > { %v958_v3 = vrot.slane %v956_v63, 4  ;;  %965 = vst.msk [vmem:[#allocation3 + $0x44] sm:$0xf] %vm1761_vm8, %v956_v63  ;;  %1396 = vmatpush3.bf16.msra.mxu1 %v1450_v2 }
 0x521   : > { %1397 = vmatprep.subr.bf16.mxu1 %v1466_v1 }
 0x522   : > { %v959_v5 = vsel %vm311_vm2, %v957_v4, %v958_v3  ;;  %v971_v8 = vpop.permute.xlu0 %970  ;;  %v1200_v4 = vld [vmem:[%s286_s11] sm:$0xff] }
 0x523   : > { %v961_v6 = vsel %vm960_vm7, %v954_v0, %v959_v5  ;;  %v973_v7 = vpop.permute.xlu1 %972  ;;  %v974_v10 = vrot.slane %v971_v8, 4  ;;  %v1201_v5 = vld [vmem:[%s286_s11 + $0x8] sm:$0xff] }
 0x524   : > { %v975_v9 = vrot.slane %v973_v7, 4  ;;  %981 = vst.msk [vmem:[#allocation3 + $0x50] sm:$0xf] %vm1762_vm10, %v973_v7  ;;  %v1351_v12 = vcombine.low %v944_v62, %v961_v6  ;;  %v1352_v13 = vcombine.high %v944_v62, %v961_v6  ;;  %v1202_v6 = vld [vmem:[%s286_s11 + $0x10] sm:$0xff] }
 0x526   : > { %v976_v14 = vsel %vm311_vm2, %v974_v10, %v975_v9  ;;  %1123 = vmatprep.subr.bf16.mxu0 %v1352_v13  ;;  %v987_v18 = vpop.permute.xlu0 %986 }
 0x527   : > { %v977_v15 = vsel %vm1763_vm0, %v971_v8, %v976_v14  ;;  %v989_v17 = vpop.permute.xlu1 %988  ;;  %v1451_v19 = vld [vmem:[#allocation3 + $0x38] ss:$12 sps:$4 sm:$0xff]   ;;  %1124 = vmatpush1.bf16.msra.mxu0 %v1351_v12  ;;  %v990_v21 = vrot.slane %v987_v18, 4 }
 0x528   : > { %v991_v20 = vrot.slane %v989_v17, 4  ;;  %998 = vst.msk [vmem:[#allocation3 + $0x5c] sm:$0xf] %vm1764_vm4, %v989_v17  ;;  %1398 = vmatpush3.bf16.msra.mxu1 %v1451_v19 }
 0x529   : > { %1399 = vmatprep.subr.bf16.mxu1 %v1466_v1 }
 0x52a   : > { %v992_v25 = vsel %vm311_vm2, %v990_v21, %v991_v20  ;;  %v1004_v27 = vpop.permute.xlu0 %1003 }
 0x52b   : > { %v994_v26 = vsel %vm993_vm12, %v987_v18, %v992_v25  ;;  %v1006_v16 = vpop.permute.xlu1 %1005  ;;  %v1007_v29 = vrot.slane %v1004_v27, 4 }
 0x52c   : > { %v1008_v28 = vrot.slane %v1006_v16, 4  ;;  %1015 = vst.msk [vmem:[#allocation3 + $0x68] sm:$0xf] %vm1765_vm14, %v1006_v16  ;;  %v1354_v30 = vcombine.low %v977_v15, %v994_v26  ;;  %v1355_v31 = vcombine.high %v977_v15, %v994_v26 }
 0x52e   : > { %v1009_v32 = vsel %vm311_vm2, %v1007_v29, %v1008_v28  ;;  %1125 = vmatprep.subr.bf16.mxu0 %v1355_v31 }
 0x52f   : > { %v1011_v33 = vsel %vm1010_vm1, %v1004_v27, %v1009_v32  ;;  %v1452_v34 = vld [vmem:[#allocation3 + $0x50] ss:$12 sps:$4 sm:$0xff]   ;;  %1126 = vmatpush1.bf16.msra.mxu0 %v1354_v30 }
 0x530   : > { %v1358_v35 = vcombine.high %v1011_v33, %v1011_v33  ;;  %v1357_v36 = vcombine.low %v1011_v33, %v1011_v33  ;;  %1400 = vmatpush3.bf16.msra.mxu1 %v1452_v34 }
 0x531   : > { %1401 = vmatprep.subr.bf16.mxu1 %v1466_v1 }
 0x532   : > { %1360 = vmatprep.subr.msk.bf16.mxu0 %vm311_vm2, %v1358_v35  ;;  %v1111_v37 = vsel %vm311_vm2, %v1357_v36, 0 }
 0x533   : > { %v1453_v38 = vld [vmem:[#allocation3 + $0x68] ss:$0 sps:$4 sm:$0xff]   ;;  %1128 = vmatpush1.bf16.msra.mxu0 %v1111_v37 }
 0x534   : > { %v1117_v40 = vsel %vm311_vm2, %v1453_v38, 0  ;;  %vm1768_vm2 = vcmask 261120  }
 0x535   : > { %1402 = vmatpush3.bf16.msra.mxu1 %v1117_v40  ;;  %vm1769_vm9 = vmmov %vm1768_vm2 }
 0x536   : > { %1361 = vmatmul.mubr.msk.bf16.vlgmr.msra.gmra.mrb[4].mxu0 %vm1766_vm11, %v1016_v39  ;;  %vm1770_vm13 = vmmov %vm1768_vm2 }
 0x538   : > { %1404 = vmatmul.mubr.msk.bf16.vlgmr.msra.gmra.mrb[4].mxu1 %vm1767_vm6, %v1016_v39 }
 0x609   : > { %v1153_v41 = vpop.f32.mrb[4].mxu0 }
 0x60a   : > { %v1203_v1 = vmul.f32 %v1153_v41, %v1614_v22  ;;  %v1155_v42 = vpop.f32.mrb[5].mxu0 }
 0x60b   : > { %v1204_v43 = vmul.f32 %v1155_v42, %v1616_v23  ;;  %v1157_v44 = vpop.f32.mrb[6].mxu0  ;;  %v1194_v45 = vpop.f32.mrb[4].mxu1 }
 0x60c   : > { %v1211_v46 = vmul.f32 %v1203_v1, %v1153_v41  ;;  %v1158_v47 = vpop.f32.mrb[7].mxu0  ;;  %v1205_v48 = vmul.f32 %v1194_v45, %v1618_v24  ;;  %v1405_v49 = vpop.f32.mrb[5].mxu1 }
 0x60d   : > { %v1212_v50 = vmul.f32 %v1204_v43, %v1155_v42  ;;  %v1206_v51 = vadd.f32 %v1204_v43, %v1203_v1  ;;  %v1197_v52 = vpop.f32.mrb[6].mxu1 }
 0x60e   : > { %v1213_v11 = vmul.f32 %v1205_v48, %v1194_v45  ;;  %v1406_v53 = vpop.f32.mrb[7].mxu1  ;;  %v1207_v54 = vsel %vm1768_vm2, %v1205_v48, 0.0 }
 0x60f   : > { %v1214_v55 = vadd.f32 %v1212_v50, %v1211_v46  ;;  %v1208_v22 = vadd.f32 %v1207_v54, %v1206_v51 }
 0x610   : > { %v1215_v56 = vsel %vm1769_vm9, %v1213_v11, 0.0 }
 0x611   : > { %1209 = vadd.xlane.f32.xlu0 %v1208_v22  ;;  %v1216_v23 = vadd.f32 %v1215_v56, %v1214_v55 }
 0x613   : > { %1217 = vadd.xlane.f32.xlu1 %v1216_v23 }
 0x69e   : > { %v1210_v57 = vpop.xlane.xlu0 %1209 }
 0x69f   : > { %v1219_v58 = vmul.f32 0.00390625, %v1210_v57 }
 0x6a0   : > { %v1218_v59 = vpop.xlane.xlu1 %1217 }
 0x6a1   : > { %v1220_v24 = vmul.f32 0.00390625, %v1218_v59  ;;  %v1221_v60 = vmul.f32 %v1219_v58, %v1219_v58  ;;  %v1223_v63 = vsub.f32 %v1153_v41, %v1219_v58  ;;  %v1224_v0 = vsub.f32 %v1155_v42, %v1219_v58 }
 0x6a2   : > { %v1225_v2 = vsub.f32 %v1194_v45, %v1219_v58 }
 0x6a3   : > { %v1222_v61 = vsub.f32 %v1220_v24, %v1221_v60 }
 0x6a5   : > { %v1226_v62 = vadd.f32 1e-05, %v1222_v61 }
 0x6a7   : > { %1456 = vrsqrt.f32 %v1226_v62 }
 0x6b1   : > { %v1457_v3 = vpop.eup %1456 }
 0x6b2   : > { %v1228_v7 = vmul.f32 %v1457_v3, %v1223_v63  ;;  %v1229_v8 = vmul.f32 %v1457_v3, %v1224_v0  ;;  %v1230_v9 = vmul.f32 %v1457_v3, %v1225_v2 }
 0x6b4   : > { %v1231_v10 = vadd.f32 %v1228_v7, %v1200_v4  ;;  %v1232_v12 = vadd.f32 %v1229_v8, %v1201_v5  ;;  %v1233_v13 = vadd.f32 %v1230_v9, %v1202_v6 }
 0x6b6   : > { %1234 = vst [vmem:[%s291_s14] sm:$0xff] %v1231_v10  ;;  %1235 = vst [vmem:[%s291_s14 + $0x8] sm:$0xff] %v1232_v12 }
 0x6b7   : > { %1236 = vst.msk [vmem:[%s291_s14 + $0x10] sm:$0xff] %vm1770_vm13, %v1233_v13 }
 0x6b8 PF: > { %s16_s21 = sadd.s32 1, %s1464_s21  }
 0x6b9   : > { %p13_p4 = scmp.ge.s32.totalorder %s16_s21, 4  }
 0x6bb   :  { %15 = sbr.rel (!%p13_p4) target bundleno = 1 (0x1), region = 80 }

</bundles_post_ra>
